<compile_context>
chip_gen: v6e
topology: v6e:2x2x1
jax: 0.10.0
libtpu: 0.0.40
codegen_flags: <defaults>
</compile_context>

<pallas_src>
import functools

import jax
import jax.numpy as jnp
from jax.experimental import pallas as pl
from jax.experimental.pallas import tpu as pltpu

_MIB = 1024 * 1024


def _round_up(x: int, m: int) -> int:
    return ((x + m - 1) // m) * m


# ---------------------------------------------------------------------------
# Kernel body
# ---------------------------------------------------------------------------
def _layernorm_cf_kernel(x_ref, w_ref, b_ref, o_ref, *, eps: float,
                         inv_c: float, bf16_affine: bool):
    # x_ref/o_ref: (nb, C, thw); w_ref/b_ref: (C, 1)
    x = x_ref[...]
    if bf16_affine:
        # fp32-accumulating moments straight from the bf16 block (no full-block
        # fp32 temporary); affine stays in bf16 (v6e/v7x VPUs have bf16).
        s1 = jnp.sum(x, axis=1, keepdims=True, dtype=jnp.float32)
        s2 = jnp.sum(x * x, axis=1, keepdims=True, dtype=jnp.float32)
    else:
        x = x.astype(jnp.float32)
        s1 = jnp.sum(x, axis=1, keepdims=True)
        s2 = jnp.sum(x * x, axis=1, keepdims=True)
    mean = s1 * inv_c
    var = jnp.maximum(s2 * inv_c - mean * mean, 0.0)
    inv = jax.lax.rsqrt(var + eps)                       # EUP, fp32

    cdt = x.dtype                                        # bf16 or fp32
    w = w_ref[...].astype(cdt)[None, :, :]               # (1, C, 1)
    b = b_ref[...].astype(cdt)[None, :, :]               # (1, C, 1)
    y = (x - mean.astype(cdt)) * inv.astype(cdt)
    o_ref[...] = (w * y + b).astype(o_ref.dtype)


# ---------------------------------------------------------------------------
# Hardware / sizing helpers
# ---------------------------------------------------------------------------
def _vmem_capacity_bytes() -> int:
    try:
        return int(pltpu.get_tpu_info().vmem_capacity_bytes)
    except Exception:
        pass
    try:
        kind = jax.devices()[0].device_kind.lower()
        if "v7" in kind:
            return 64 * _MIB
        if "v5" in kind or "v6" in kind:
            return 128 * _MIB
    except Exception:
        pass
    return 64 * _MIB  # unknown -> conservative


def _is_v5e() -> bool:
    try:
        kind = jax.devices()[0].device_kind.lower()
        return ("v5e" in kind) or ("v5 lite" in kind) or ("v5litepod" in kind)
    except Exception:
        return False


def _vmem_bytes_estimate(nb: int, c: int, thw: int, itemsize: int) -> int:
    """Double-buffered x/out blocks + ~3 fp32 temporaries + lane-padded params."""
    blk = nb * c * thw
    params = 2 * 2 * _round_up(c, 8) * 128 * 4   # two (C,1) tiles, lane-padded, x2 buffers
    return 2 * 2 * blk * itemsize + 3 * blk * 4 + params


def _choose_block(n: int, c: int, hw: int, itemsize: int, *,
                  target_bytes: int, budget_bytes: int):
    """Pick (nb, thw) sized by bytes; returns None if C can't fit even at thw=128."""
    hw_tile_cap = _round_up(hw, 128)
    thw = _round_up(max(1, target_bytes // max(1, c * itemsize)), 128)
    thw = max(128, min(thw, hw_tile_cap))
    while thw > 128 and _vmem_bytes_estimate(1, c, thw, itemsize) > budget_bytes:
        thw = max(128, _round_up(thw // 2, 128))
    if _vmem_bytes_estimate(1, c, thw, itemsize) > budget_bytes:
        return None

    hw_tiles = pl.cdiv(hw, thw)
    # Fold batch elements while per-sample blocks are small, but keep enough
    # grid steps for the pipeliner / v7x megacore to have work to overlap.
    min_steps = min(4, n * hw_tiles)
    nb = 1
    for cand in range(n, 0, -1):
        if n % cand:
            continue
        if cand > 1 and cand * c * thw * itemsize > target_bytes:
            continue
        if (n // cand) * hw_tiles < min_steps:
            continue
        if _vmem_bytes_estimate(cand, c, thw, itemsize) > budget_bytes:
            continue
        nb = cand
        break
    return nb, thw, hw_tiles


def _xla_layer_norm_cf(x, weight, bias, eps):
    mean = jnp.mean(x.astype(jnp.float32), axis=1, keepdims=True)
    var = jnp.mean((x.astype(jnp.float32) - mean) ** 2, axis=1, keepdims=True)
    y = (x.astype(jnp.float32) - mean) * jax.lax.rsqrt(var + eps)
    out = weight.astype(jnp.float32)[None, :, None, None] * y \
        + bias.astype(jnp.float32)[None, :, None, None]
    return out.astype(x.dtype)


# ---------------------------------------------------------------------------
# Public wrapper
# ---------------------------------------------------------------------------
def layer_norm_channels_first(x: jax.Array, weight: jax.Array, bias: jax.Array,
                              eps: float = 1e-6, *,
                              force_pallas: bool = False) -> jax.Array:
    """LayerNorm over the channel axis of an NCHW tensor (data_format='channels_first')."""
    n, c, h, w = x.shape
    hw = h * w
    itemsize = jnp.dtype(x.dtype).itemsize

    cap = _vmem_capacity_bytes()
    small_vmem = cap <= 64 * _MIB                     # v7x-class
    block_budget = (32 if small_vmem else 64) * _MIB
    vmem_limit_cap = (48 if small_vmem else 96) * _MIB
    target_bytes = (1 if small_vmem else 2) * _MIB

    # Tiny-C regime: each (8,128) vreg / VMEM block is mostly sublane padding,
    # fused XLA wins. Huge-C regime: block doesn't fit VMEM even at thw=128.
    # TODO(synk): for very large C, split C over a third "arbitrary" grid axis
    # with partial-sum scratch instead of falling back to XLA.
    min_c = 16 if x.dtype == jnp.bfloat16 else 8
    choice = None
    if force_pallas or c >= min_c:
        choice = _choose_block(n, c, hw, itemsize,
                               target_bytes=target_bytes,
                               budget_bytes=block_budget)
    if choice is None:
        return _xla_layer_norm_cf(x, weight, bias, eps)

    nb, thw, hw_tiles = choice
    grid = (n // nb, hw_tiles)

    x3 = x.reshape(n, c, hw)          # no padding: edge lane-tile is masked
    w2 = weight.reshape(c, 1)
    b2 = bias.reshape(c, 1)

    bf16_affine = (x.dtype == jnp.bfloat16) and not _is_v5e()

    est = _vmem_bytes_estimate(nb, c, thw, itemsize)
    vmem_limit = int(min(max(2 * est, 16 * _MIB), vmem_limit_cap))

    out = pl.pallas_call(
        functools.partial(_layernorm_cf_kernel, eps=eps, inv_c=1.0 / c,
                          bf16_affine=bf16_affine),
        out_shape=jax.ShapeDtypeStruct((n, c, hw), x.dtype),
        grid_spec=pltpu.PrefetchScalarGridSpec(
            num_scalar_prefetch=0,
            grid=grid,
            in_specs=[
                pl.BlockSpec((nb, c, thw), lambda i, j: (i, 0, j)),
                pl.BlockSpec((c, 1), lambda i, j: (0, 0)),   # resident weight
                pl.BlockSpec((c, 1), lambda i, j: (0, 0)),   # resident bias
            ],
            out_specs=pl.BlockSpec((nb, c, thw), lambda i, j: (i, 0, j)),
        ),
        compiler_params=pltpu.CompilerParams(
            dimension_semantics=("parallel", "parallel"),
            vmem_limit_bytes=vmem_limit,
        ),
    )(x3, w2, b2)

    return out.reshape(n, c, h, w)


def _reference_layer_norm_cf(x, weight, bias, eps=1e-6):
    mean = jnp.mean(x, axis=1, keepdims=True)
    var = jnp.mean((x - mean) ** 2, axis=1, keepdims=True)
    y = (x - mean) / jnp.sqrt(var + eps)
    return weight[None, :, None, None] * y + bias[None, :, None, None]


if __name__ == "__main__":
    key = jax.random.PRNGKey(0)
    k1, k2 = jax.random.split(key)

    # Shape matching the module's expected small test: NCHW = (2, 4, 16, 16).
    N, C, H, W = 2, 4, 16, 16
    x = jax.random.normal(k1, (N, C, H, W), dtype=jnp.float32)
    weight = jnp.ones((C,), dtype=jnp.float32)   # nn.Parameter(torch.ones(C))
    bias = jnp.zeros((C,), dtype=jnp.float32)    # nn.Parameter(torch.zeros(C))

    out = layer_norm_channels_first(x, weight, bias, eps=1e-6, force_pallas=True)
    out = jax.block_until_ready(out)
    ref = _reference_layer_norm_cf(x, weight, bias, eps=1e-6)
    assert out.shape == (N, C, H, W)
    assert jnp.allclose(out, ref, atol=1e-5, rtol=1e-5)

    # Second shape: default Pallas path (C >= 8) with a masked edge lane-tile
    # (hw = 576 is not a multiple of 128) — no wrapper pad / slice round trip.
    N2, C2, H2, W2 = 2, 32, 24, 24
    x2 = jax.random.normal(k2, (N2, C2, H2, W2), dtype=jnp.float32)
    w2 = jax.random.normal(jax.random.PRNGKey(2), (C2,), dtype=jnp.float32)
    b2 = jax.random.normal(jax.random.PRNGKey(3), (C2,), dtype=jnp.float32)
    out2 = jax.block_until_ready(layer_norm_channels_first(x2, w2, b2, eps=1e-6))
    ref2 = _reference_layer_norm_cf(x2, w2, b2, eps=1e-6)
    assert out2.shape == (N2, C2, H2, W2)
    assert jnp.allclose(out2, ref2, atol=1e-4, rtol=1e-4)

    print("KERNEL_OK")
</pallas_src>

<mosaic_0001>
module attributes {stable_mosaic.version = 11 : i64} {
  func.func @_layernorm_cf_kernel(%arg0: i32, %arg1: i32, %arg2: memref<1x4x256xf32, #tpu.memory_space<vmem>>, %arg3: memref<4x1xf32, #tpu.memory_space<vmem>>, %arg4: memref<4x1xf32, #tpu.memory_space<vmem>>, %arg5: memref<1x4x256xf32, #tpu.memory_space<vmem>>) attributes {dimension_semantics = [#tpu.dimension_semantics<parallel>, #tpu.dimension_semantics<parallel>], iteration_bounds = array<i64: 2, 1>, scalar_prefetch = 0 : i64, scratch_operands = 0 : i64, tpu.core_type = #tpu.core_type<tc>, window_params = [{transform_indices = @transform_0, window_bounds = array<i64: 1, 4, 256>}, {pipeline_mode = #tpu.pipeline_mode<synchronous>, transform_indices = @transform_1, window_bounds = array<i64: 4, 1>}, {pipeline_mode = #tpu.pipeline_mode<synchronous>, transform_indices = @transform_2, window_bounds = array<i64: 4, 1>}, {transform_indices = @transform_3, window_bounds = array<i64: 1, 4, 256>}]} {
    %c0 = arith.constant 0 : index
    %c0_0 = arith.constant 0 : index
    %c0_1 = arith.constant 0 : index
    %0 = vector.load %arg2[%c0, %c0_0, %c0_1] : memref<1x4x256xf32, #tpu.memory_space<vmem>>, vector<1x4x256xf32>
    %cst = arith.constant dense<0.000000e+00> : vector<1x256xf32>
    %1 = vector.multi_reduction <add>, %0, %cst [1] : vector<1x4x256xf32> to vector<1x256xf32>
    %2 = vector.shape_cast %1 : vector<1x256xf32> to vector<1x1x256xf32>
    %3 = arith.mulf %0, %0 : vector<1x4x256xf32>
    %cst_2 = arith.constant dense<0.000000e+00> : vector<1x256xf32>
    %4 = vector.multi_reduction <add>, %3, %cst_2 [1] : vector<1x4x256xf32> to vector<1x256xf32>
    %5 = vector.shape_cast %4 : vector<1x256xf32> to vector<1x1x256xf32>
    %cst_3 = arith.constant 2.500000e-01 : f32
    %6 = vector.broadcast %cst_3 : f32 to vector<1x1x256xf32>
    %7 = arith.mulf %2, %6 : vector<1x1x256xf32>
    %cst_4 = arith.constant 2.500000e-01 : f32
    %8 = vector.broadcast %cst_4 : f32 to vector<1x1x256xf32>
    %9 = arith.mulf %5, %8 : vector<1x1x256xf32>
    %10 = arith.mulf %7, %7 : vector<1x1x256xf32>
    %11 = arith.subf %9, %10 : vector<1x1x256xf32>
    %cst_5 = arith.constant 0.000000e+00 : f32
    %12 = vector.broadcast %cst_5 : f32 to vector<1x1x256xf32>
    %13 = arith.maximumf %11, %12 : vector<1x1x256xf32>
    %cst_6 = arith.constant 9.99999997E-7 : f32
    %14 = vector.broadcast %cst_6 : f32 to vector<1x1x256xf32>
    %15 = arith.addf %13, %14 : vector<1x1x256xf32>
    %16 = math.rsqrt %15 : vector<1x1x256xf32>
    %c0_7 = arith.constant 0 : index
    %c0_8 = arith.constant 0 : index
    %17 = vector.load %arg3[%c0_7, %c0_8] : memref<4x1xf32, #tpu.memory_space<vmem>>, vector<4x1xf32>
    %18 = vector.shape_cast %17 : vector<4x1xf32> to vector<1x4x1xf32>
    %c0_9 = arith.constant 0 : index
    %c0_10 = arith.constant 0 : index
    %19 = vector.load %arg4[%c0_9, %c0_10] : memref<4x1xf32, #tpu.memory_space<vmem>>, vector<4x1xf32>
    %20 = vector.shape_cast %19 : vector<4x1xf32> to vector<1x4x1xf32>
    %21 = vector.broadcast %7 : vector<1x1x256xf32> to vector<1x4x256xf32>
    %22 = arith.subf %0, %21 : vector<1x4x256xf32>
    %23 = vector.broadcast %16 : vector<1x1x256xf32> to vector<1x4x256xf32>
    %24 = arith.mulf %22, %23 : vector<1x4x256xf32>
    %25 = vector.broadcast %18 : vector<1x4x1xf32> to vector<1x4x256xf32>
    %26 = arith.mulf %25, %24 : vector<1x4x256xf32>
    %27 = vector.broadcast %20 : vector<1x4x1xf32> to vector<1x4x256xf32>
    %28 = arith.addf %26, %27 : vector<1x4x256xf32>
    %c0_11 = arith.constant 0 : index
    %c0_12 = arith.constant 0 : index
    %c0_13 = arith.constant 0 : index
    %29 = vector.load %arg5[%c0_11, %c0_12, %c0_13] : memref<1x4x256xf32, #tpu.memory_space<vmem>>, vector<1x4x256xf32>
    tpu.vector_store %arg5[%c0_11, %c0_12, %c0_13], %28 {strides = array<i32>} : memref<1x4x256xf32, #tpu.memory_space<vmem>>, vector<1x4x256xf32>,
    return
  }
  func.func @transform_0(%arg0: i32, %arg1: i32) -> (i32, i32, i32) {
    %c0_i32 = arith.constant 0 : i32
    %c0_i32_0 = arith.constant 0 : i32
    return %arg0, %c0_i32, %arg1 : i32, i32, i32
  }
  func.func @transform_1(%arg0: i32, %arg1: i32) -> (i32, i32) {
    %c0_i32 = arith.constant 0 : i32
    %c0_i32_0 = arith.constant 0 : i32
    %c0_i32_1 = arith.constant 0 : i32
    return %c0_i32, %c0_i32_0 : i32, i32
  }
  func.func @transform_2(%arg0: i32, %arg1: i32) -> (i32, i32) {
    %c0_i32 = arith.constant 0 : i32
    %c0_i32_0 = arith.constant 0 : i32
    %c0_i32_1 = arith.constant 0 : i32
    return %c0_i32, %c0_i32_0 : i32, i32
  }
  func.func @transform_3(%arg0: i32, %arg1: i32) -> (i32, i32, i32) {
    %c0_i32 = arith.constant 0 : i32
    %c0_i32_0 = arith.constant 0 : i32
    return %arg0, %c0_i32, %arg1 : i32, i32, i32
  }
}

</mosaic_0001>

<bundles_post_ra>
// kernel: tpu_custom_call.1
= control target key start
LH: loop header
LB: loop body
LE: loop exit
PB: predicated region body
PF: predicated region fallthrough
CT: control target
= control target key end

     0   :  { %8 = vsyncpa [#allocation3], 0  ;;  %s756_s0 = inlined_call_operand.hbm [shape: f32[2,4,256], index: 0, kind: input, shape index: {}]   ;;  %s757_s1 = inlined_call_operand.vmem [shape: f32[4,1], index: 1, kind: input, shape index: {}]   ;;  %s758_s2 = inlined_call_operand.vmem [shape: f32[4,1], index: 2, kind: input, shape index: {}]   ;;  %s759_s3 = inlined_call_operand.hbm [shape: f32[2,4,256], index: 3, kind: output, shape index: {}]  }
   0x1   :  { %10 = vsyncpa [#allocation3 + $0x1], 0 }
   0x2   :  { %11 = vsyncpa [#allocation4], 0 }
   0x3   :  { %13 = vsyncpa [#allocation4 + $0x1], 0  ;;  %s612_s12 = smov 0   ;;  %s614_s13 = smov 0  }
   0x4   :  { %s616_s14 = smov 0   ;;  %s618_s15 = smov 0  }
   0x5   :  { %s620_s16 = smov 0   ;;  %s622_s17 = smov 0  }
   0x6 LB: > { %s393_s18 = sadd.s32 4294967295, %s587_s17   ;;  %s394_s19 = sadd.s32 4294967294, %s587_s17   ;;  %s587_s17 = sphi %s622_s17, %s19_s17   ;;  %s583_s16 = sphi %s620_s16, %s771_s16   ;;  %s579_s15 = sphi %s618_s15, %s770_s15   ;;  %s575_s14 = sphi %s616_s14, %s769_s14   ;;  %s571_s13 = sphi %s614_s13, %s768_s13   ;;  %s567_s12 = sphi %s612_s12, %s767_s12  }
   0x7   : > { %s31_s20 = sadd.s32 1, %s583_s16  ;;  %s40_s21 = sadd.s32 1, %s575_s14 }
   0x8   : > { %p33_p0 = scmp.ge.s32.totalorder %s31_s20, 2  ;;  %p47_p1 = scmp.ne.s32.totalorder %s575_s14, %s571_s13 }
   0x9   : > { %p48_p2 = scmp.eq.s32.totalorder %s587_s17, 0  ;;  %p53_p3 = scmp.ne.s32.totalorder %s571_s13, %s567_s12 }
   0xa   : > { %s773_s20 = smov (%p33_p0, %s31_s20), 0  ;;  %p54_p5 = scmp.eq.s32.totalorder %s393_s18, 0 }
   0xb   : > { %p653_p4 = por %p48_p2, %p47_p1  ;;  %s35_s23 = ssub.s32 %s583_s16, %s773_s20 }
   0xc   : > { %p121_p6 = scmp.eq.s32.totalorder %s393_s18, 1  ;;  %p38_p7 = scmp.eq.s32.totalorder %s35_s23, 0 }
   0xd   : > { %p659_p8 = por %p54_p5, %p53_p3  ;;  %p127_p10 = scmp.eq.s32.totalorder %s394_s19, 1 }
   0xe   : > { %p663_p9 = por %p121_p6, %p47_p1  ;;  %p422_p13 = scmp.lt.s32.totalorder %s587_s17, 2 }
   0xf   : > { %s668_s26 = scalar_select %p38_p7, %s575_s14, %s40_s21  }
  0x10   : > { %p670_p11 = por %p127_p10, %p53_p3  ;;  %s153_s28 = sand.u32 1, %s575_s14  }
  0x11   : > { %s397_s29 = sshll.u32 %s153_s28, 3  ;;  %s408_s30 = sshll.u32 %s583_s16, 7 }
  0x12   : > { %s763_s27 = scalar_select %p670_p11, 1, 0 }
  0x13   : > { %s165_s6 = scalar_lea.hbm %s756_s0, %s408_s30  ;;  %s157_s7 = scalar_lea.vmem [#allocation2], %s397_s29 }
  0x14   : > { %s167_s8 = sshll.u32 %s157_s7, 4  ;;  %p683_p0 = pnand %p422_p13, %p653_p4  ;;  %s168_s8 = int_to_ptr.vmem [resolvable:$true] %s167_s8 }
  0x15   : > { %p400_p1 = scmp.ge.s32.totalorder %s587_s17, 1  ;;  %p172_p2 = scmp.lt.s32.totalorder %s587_s17, 3 }
  0x16   : > { %s154_s10 = scalar_lea.sflag [#allocation3], %s153_s28  ;;  %p481_p3 = pneg %p683_p0 }
  0x17   : > { %s492_s11 = scalar_lea.vmem %s168_s8, 128  ;;  %s589_s18 = smov [#allocation2]  }
  0x18   : > { %p493_p5 = scmp.ne.s32.totalorder %s168_s8, %s492_s11  ;;  %s497_s19 = sshll.u32 %s589_s18, 4  ;;  %s498_s19 = int_to_ptr.vmem [resolvable:$false] %s497_s19 }
  0x19   : > { %s499_s21 = scalar_lea.vmem %s498_s19, 256  ;;  %p500_p10 = scmp.lt.s32.totalorder %s168_s8, %s498_s19 }
  0x1a   : > { %p495_p6 = pnand %p493_p5, %p481_p3  ;;  %p501_p12 = scmp.lt.s32.totalorder %s499_s21, %s492_s11 }
  0x1c   : > { %p496_p7 = pneg %p495_p6  ;;  %p502_p4 = por %p501_p12, %p500_p10 }
  0x1e   : > { %p503_p13 = pnand %p502_p4, %p496_p7 }
  0x20   : > { %506 = shalt.err (!%p503_p13)
}
  0x21   : > { %417 = dma.hbm_to_vmem [thread:$0]  (!%p683_p0), %s165_s6, 128, %s168_s8, %s154_s10  }
  0x22   : > { %p173_p11 = pnand %p400_p1, %p172_p2 }
  0x23   : > { %s698_s22 = sand.u32 (!%p173_p11), 1, %s571_s13  }
  0x24   : > { %176 = sbr.rel (%p173_p11) target bundleno = 189 (0xbd), region = 32  ;;  %s401_s23 = sshll.u32 (!%p173_p11), %s698_s22, 3 }
  0x25   : > { %s179_s28 = scalar_lea.sflag (!%p173_p11), [#allocation3], %s698_s22  ;;  %s182_s29 = scalar_lea.vmem (!%p173_p11), [#allocation2], %s401_s23 }
  0x29   : > { %558 = dma.done.wait (%p659_p8), %s179_s28, 128  }
  0x2a   : > { %560 = vsyncadd (%p659_p8), %s179_s28, 4294967168  ;;  %v590_v0 = vmov 0   ;;  %v258_v1 = vld [vmem:[%s757_s1] sm:$0xf]  ;;  %vm211_vm0 = vcmask 1043456   ;;  %s409_s24 = sshll.u32 %s579_s15, 7 }
  0x2b   : > { %473 = vset.pattern.permute.xlu0 %v590_v0  ;;  %v259_v2 = vld [vmem:[%s758_s2] sm:$0xf]  ;;  %s204_s7 = scalar_lea.vmem [#allocation5], %s401_s23  ;;  %s307_s11 = scalar_lea.hbm %s759_s3, %s409_s24 }
  0x2c   : > { %272 = vperm.xlu0 %473, %v258_v1   ;;  %v207_v3 = vld [vmem:[%s182_s29] sm:$0xff]  ;;  %s309_s8 = sshll.u32 %s204_s7, 4  ;;  %s293_s18 = scalar_lea.sflag [#allocation4], %s698_s22  ;;  %s310_s8 = int_to_ptr.vmem [resolvable:$true] %s309_s8 }
  0x2d   : > { %v209_v4 = vcombine.high %v207_v3, %v207_v3  ;;  %v226_v5 = vmul.f32 %v207_v3, %v207_v3  ;;  %v212_v6 = vsel %vm211_vm0, %v207_v3, 0.0  ;;  %s507_s19 = scalar_lea.vmem %s310_s8, 128  ;;  %s591_s21 = smov [#allocation5]  }
  0x2e   : > { %v213_v9 = vrot.slane %v212_v6, 4  ;;  %p508_p8 = scmp.ne.s32.totalorder %s310_s8, %s507_s19  ;;  %s511_s15 = sshll.u32 %s591_s21, 4  ;;  %s512_s15 = int_to_ptr.vmem [resolvable:$false] %s511_s15 }
  0x2f   : > { %v219_v7 = vsel %vm211_vm0, %v209_v4, 0.0  ;;  %v228_v8 = vcombine.high %v226_v5, %v226_v5  ;;  %v230_v11 = vsel %vm211_vm0, %v226_v5, 0.0  ;;  %s513_s23 = scalar_lea.vmem %s512_s15, 256  ;;  %p514_p0 = scmp.lt.s32.totalorder %s310_s8, %s512_s15 }
  0x30   : > { %282 = vperm.xlu0 %473, %v259_v2   ;;  %v220_v10 = vrot.slane %v219_v7, 4  ;;  %v214_v13 = vadd.f32 %v213_v9, %v212_v6  ;;  %v231_v14 = vrot.slane %v230_v11, 4  ;;  %p509_p11 = pnand %p508_p8, %p663_p9  ;;  %p515_p1 = scmp.lt.s32.totalorder %s513_s23, %s507_s19 }
  0x31   : > { %v237_v12 = vsel %vm211_vm0, %v228_v8, 0.0 }
  0x32   : > { %v221_v15 = vadd.f32 %v220_v10, %v219_v7  ;;  %v238_v16 = vrot.slane %v237_v12, 4  ;;  %v215_v17 = vrot.slane %v214_v13, 2  ;;  %v232_v18 = vadd.f32 %v231_v14, %v230_v11  ;;  %p510_p12 = pneg %p509_p11  ;;  %p516_p2 = por %p515_p1, %p514_p0 }
  0x34   : > { %v222_v19 = vrot.slane %v221_v15, 2  ;;  %v239_v20 = vadd.f32 %v238_v16, %v237_v12  ;;  %v216_v21 = vadd.f32 %v215_v17, %v214_v13  ;;  %v233_v22 = vrot.slane %v232_v18, 2  ;;  %p517_p3 = pnand %p516_p2, %p510_p12 }
  0x36   : > { %v223_v23 = vadd.f32 %v222_v19, %v221_v15  ;;  %v240_v24 = vrot.slane %v239_v20, 2  ;;  %v217_v25 = vrot.slane %v216_v21, 1  ;;  %v234_v26 = vadd.f32 %v233_v22, %v232_v18 }
  0x38   : > { %v224_v27 = vrot.slane %v223_v23, 1  ;;  %v241_v28 = vadd.f32 %v240_v24, %v239_v20  ;;  %v218_v29 = vadd.f32 %v217_v25, %v216_v21  ;;  %v235_v30 = vrot.slane %v234_v26, 1 }
  0x3a   : > { %v225_v31 = vadd.f32 %v224_v27, %v223_v23  ;;  %v242_v32 = vrot.slane %v241_v28, 1  ;;  %v236_v33 = vadd.f32 %v235_v30, %v234_v26  ;;  %v244_v34 = vmul.f32 0.25, %v218_v29 }
  0x3c   : > { %v243_v35 = vadd.f32 %v242_v32, %v241_v28  ;;  %v245_v36 = vmul.f32 0.25, %v225_v31  ;;  %v246_v37 = vmul.f32 0.25, %v236_v33  ;;  %v248_v38 = vmul.f32 %v244_v34, %v244_v34 }
  0x3e   : > { %v247_v39 = vmul.f32 0.25, %v243_v35  ;;  %v249_v40 = vmul.f32 %v245_v36, %v245_v36  ;;  %v250_v41 = vsub.f32 %v246_v37, %v248_v38  ;;  %v262_v48 = vcombine.low %v244_v34, %v245_v36 }
  0x40   : > { %v251_v42 = vsub.f32 %v247_v39, %v249_v40  ;;  %v252_v43 = vmax.f32 %v250_v41, 0.0  ;;  %v264_v50 = vsub.f32 %v207_v3, %v262_v48 }
  0x42   : > { %v253_v44 = vmax.f32 %v251_v42, 0.0  ;;  %v254_v45 = vadd.f32 1e-06, %v252_v43 }
  0x44   : > { %v255_v46 = vadd.f32 1e-06, %v253_v44  ;;  %475 = vrsqrt.f32 %v254_v45 }
  0x46   : > { %477 = vrsqrt.f32 %v255_v46 }
  0x51   : > { %v476_v47 = vpop.eup %475 }
  0x53   : > { %v478_v49 = vpop.eup %477 }
  0x54   : > { %v267_v51 = vcombine.low %v476_v47, %v478_v49 }
  0x56   : > { %v269_v52 = vmul.f32 %v267_v51, %v264_v50 }
  0x58   : > { %v276_v53 = vcombine.high %v269_v52, %v269_v52 }
  0xa7   : > { %v273_v54 = vpop.permute.xlu0 %272 }
  0xa8   : > { %v278_v55 = vmul.f32 %v273_v54, %v269_v52  ;;  %v279_v56 = vmul.f32 %v276_v53, %v273_v54 }
  0xab   : > { %v283_v57 = vpop.permute.xlu0 %282 }
  0xac   : > { %v285_v58 = vadd.f32 %v283_v57, %v278_v55  ;;  %v286_v59 = vadd.f32 %v283_v57, %v279_v56 }
  0xae   : > { %v289_v60 = vcombine.low %v285_v58, %v286_v59 }
  0xb0   : > { %291 = vst [vmem:[%s204_s7] sm:$0xff] %v289_v60 }
  0xb1   : > { %520 = shalt.err (!%p517_p3)
}
  0xb2   : > { %s521_s28 = scalar_lea.hbm %s307_s11, 128  ;;  %s525_s30 = scalar_lea.hbm %s759_s3, 256 }
  0xb3   : > { %p522_p5 = scmp.ne.s32.totalorder %s307_s11, %s521_s28  ;;  %p526_p10 = scmp.lt.s32.totalorder %s307_s11, %s759_s3 }
  0xb4   : > { %p527_p4 = scmp.lt.s32.totalorder %s525_s30, %s521_s28 }
  0xb5   : > { %p523_p6 = pnand %p522_p5, %p663_p9 }
  0xb6   : > { %p528_p13 = por %p527_p4, %p526_p10 }
  0xb7   : > { %p524_p7 = pneg %p523_p6 }
  0xb9   : > { %p529_p8 = pnand %p528_p13, %p524_p7 }
  0xbb   : > { %532 = shalt.err (!%p529_p8)
}
  0xbc   : > { %412 = dma.vmem_to_hbm [thread:$0]  (%p663_p9), %s310_s8, 128, %s307_s11, %s293_s18  }
  0xbd PF: > { %s321_s6 = sand.u32 1, %s567_s12   ;;  %p765_p11 = scmp.ne.s32.totalorder %s763_s27, 0 }
  0xbe   : > { %p766_p12 = scmp.ge.s32.totalorder %s587_s17, 2  ;;  %s322_s24 = scalar_lea.sflag [#allocation4], %s321_s6 }
  0xc0   : > { %p419_p0 = pnand %p766_p12, %p765_p11 }
  0xc2   : > { %p420_p1 = pneg %p419_p0 }
  0xc4   : > { %562 = dma.done.wait (%p420_p1), %s322_s24, 128  }
  0xc5   : > { %564 = vsyncadd (%p420_p1), %s322_s24, 4294967168  ;;  %s19_s17 = sadd.s32 1, %s587_s17   ;;  %s767_s12 = smov %s571_s13 }
  0xc6   : > { %p16_p2 = scmp.ge.s32.totalorder %s19_s17, 4   ;;  %s768_s13 = smov %s575_s14 }
  0xc7   : > { %s769_s14 = smov %s668_s26  ;;  %s770_s15 = smov %s583_s16 }
  0xc8   : > { %s771_s16 = smov %s773_s20  ;;  %18 = sbr.rel (!%p16_p2) target bundleno = 6 (0x6), region = 77 }
  0xcd   :  { %327 = vsyncpa [#allocation3], 1 }
  0xce   :  { %329 = vsyncpa [#allocation3 + $0x1], 1 }
  0xcf   :  { %330 = vsyncpa [#allocation4], 1 }
  0xd0   :  { %332 = vsyncpa [#allocation4 + $0x1], 1 }

</bundles_post_ra>
